<compile_context>
chip_gen: v7x
topology: tpu7x:2x2x1
jax: 0.10.0
libtpu: 0.0.40
codegen_flags: <defaults>
</compile_context>

<pallas_src>
import functools

import jax
import jax.numpy as jnp
from jax import lax
from jax.experimental import pallas as pl
from jax.experimental.pallas import tpu as pltpu

# Finite "-inf" sentinel for suppressed / invalid candidates.
NEG = -1e30


def _round_up(x, m):
    return (x + m - 1) // m * m


def _max_all(x):
    # Full (T, L) max: sublane (T) axis first (mostly VPU), lanes last (XLU).
    return jnp.max(jnp.max(x, axis=0, keepdims=True))


def _min_all(x):
    return jnp.min(jnp.min(x, axis=0, keepdims=True))


def _nms_kernel(data_ref, out_ref, s_ref, *, n_valid, iou_threshold,
                score_threshold, max_detection, mpad):
    """Greedy NMS over dense (T, 128) anchor tiles.

    data_ref: (1, 5, T, 128) planes = [cx, cy, w, h, objectness]
    out_ref : (1, 8, Mpad) rows = [x1, y1, x2, y2, score, flat_idx, 0, 0];
              lane `max_detection` of every row carries the detection count.
    s_ref   : (T, 128) f32 VMEM scratch holding the live candidate scores.
    """
    T = data_ref.shape[2]
    L = data_ref.shape[3]

    xc = data_ref[0, 0]
    yc = data_ref[0, 1]
    w = data_ref[0, 2]
    h = data_ref[0, 3]
    obj = data_ref[0, 4]

    # xywh -> x1y1x2y2 (loop invariant, computed once).
    x1 = xc - 0.5 * w
    y1 = yc - 0.5 * h
    x2 = xc + 0.5 * w
    y2 = yc + 0.5 * h
    area = (x2 - x1) * (y2 - y1)                                   # (T, L)
    boxes4 = jnp.concatenate(
        [x1[None], y1[None], x2[None], y2[None]], axis=0)          # (4, T, L)

    # Flat anchor index as f32 (exact below 2^24 anchors); min-index tie-break.
    flat = (lax.broadcasted_iota(jnp.int32, (T, L), 0) * L
            + lax.broadcasted_iota(jnp.int32, (T, L), 1)).astype(jnp.float32)
    big_idx = jnp.float32(T * L)

    valid = jnp.logical_and(flat < n_valid, obj >= score_threshold)
    s0 = jnp.where(valid, obj, NEG)
    s_ref[...] = s0
    m0 = _max_all(s0)

    det_lane = lax.broadcasted_iota(jnp.int32, (1, mpad), 1)       # (1, Mpad)
    out_ref[...] = jnp.zeros_like(out_ref)

    ones11 = jnp.ones((1, 1), jnp.float32)
    zeros21 = jnp.zeros((2, 1), jnp.float32)

    def cond(carry):
        r, m = carry
        # Early exit: stop when no candidate remains above the threshold.
        return jnp.logical_and(r < max_detection, m > NEG * 0.5)

    def body(carry):
        r, m = carry
        s = s_ref[...]

        # ---- argmax (first index on ties) of remaining candidates --------
        idx = _min_all(jnp.where(s == m, flat, big_idx))           # scalar f32
        onehot = flat == idx                                       # (T, L)

        # ---- extract ONLY the 4 box coords of the best anchor ------------
        # (score is already `m`); reduce T (sublanes) first, lanes last.
        masked = jnp.where(onehot[None, :, :], boxes4, NEG)        # (4, T, L)
        best = jnp.max(jnp.max(masked, axis=1, keepdims=True),
                       axis=2, keepdims=True)                      # (4, 1, 1)
        bx1 = best[0]
        by1 = best[1]
        bx2 = best[2]
        by2 = best[3]                                              # (1, 1) each
        barea = (bx2 - bx1) * (by2 - by1)

        # ---- suppress overlaps: divide-free IoU test ----------------------
        iw = jnp.maximum(jnp.minimum(bx2, x2) - jnp.maximum(bx1, x1), 0.0)
        ih = jnp.maximum(jnp.minimum(by2, y2) - jnp.maximum(by1, y1), 0.0)
        inter = iw * ih
        union = barea + area - inter
        # inter/union > thr  <=>  inter > thr * union   (inter, union >= 0)
        suppress = jnp.logical_or(onehot, inter > iou_threshold * union)
        s_new = jnp.where(suppress, NEG, s)
        s_ref[...] = s_new

        # ---- scatter [x1,y1,x2,y2,score,idx] into detection lane r --------
        vals8 = jnp.concatenate(
            [best[:, :, 0], m * ones11, idx * ones11, zeros21], axis=0)  # (8,1)
        slot = (det_lane == r).astype(jnp.float32)                 # (1, Mpad)
        out_ref[0] = out_ref[0] + vals8 * slot                     # (8, Mpad)

        return r + 1, _max_all(s_new)

    r, _ = lax.while_loop(cond, body, (jnp.int32(0), m0))

    # Lane `max_detection` carries the valid-detection count on every row.
    count_slot = (det_lane == max_detection).astype(jnp.float32)   # (1, Mpad)
    out_ref[0] = out_ref[0] + r.astype(jnp.float32) * count_slot


def _run_nms(data, *, n_valid, iou_threshold, score_threshold, max_detection):
    B, F5, T, L = data.shape
    npad = T * L
    mpad = _round_up(max_detection + 1, 128)

    kernel = functools.partial(
        _nms_kernel,
        n_valid=int(n_valid),
        iou_threshold=float(iou_threshold),
        score_threshold=float(score_threshold),
        max_detection=int(max_detection),
        mpad=mpad,
    )

    # VMEM: double-buffered (5, T, 128) input block + (T, 128) score scratch
    # + loop-invariant xyxy/area/flat/boxes4 planes and per-iteration temps
    # (~22 planes) + tiny output block; clamped to 90% of physical VMEM
    # (v7x = 64 MiB, v5e/v6e = 128 MiB).
    vmem_need = (2 * F5 * npad + npad + 22 * npad + 4 * 8 * mpad) * 4 + (2 << 20)
    try:
        vmem_cap = int(pltpu.get_tpu_info().vmem_capacity_bytes)
    except Exception:
        vmem_cap = 64 * 1024 * 1024
    vmem_limit = int(min(max(vmem_need, 8 * 1024 * 1024), int(vmem_cap * 0.9)))

    return pl.pallas_call(
        kernel,
        out_shape=jax.ShapeDtypeStruct((B, 8, mpad), jnp.float32),
        grid_spec=pltpu.PrefetchScalarGridSpec(
            num_scalar_prefetch=0,
            grid=(B,),
            in_specs=[pl.BlockSpec((1, F5, T, L), lambda b: (b, 0, 0, 0))],
            out_specs=pl.BlockSpec((1, 8, mpad), lambda b: (b, 0, 0)),
            scratch_shapes=[pltpu.VMEM((T, L), jnp.float32)],
        ),
        compiler_params=pltpu.CompilerParams(
            # Megacore: batch elements across TensorCores.  Only engages both
            # v7x cores when B >= 2; for B == 1 serving one TC idles.
            dimension_semantics=("parallel",),
            vmem_limit_bytes=vmem_limit),
    )(data)


def postprocess(raw_yolo_output, iou_threshold=0.5, score_threshold=0.5,
                max_detection=100, prefilter_topk=None):
    """JAX/Pallas equivalent of Postprocess.forward.

    raw_yolo_output: list of tuples (boxes_xywh, objectness, class_prob) per
    detection head, reshapeable to (B, -1, 4), (B, -1, 1), (B, -1, C).
    Returns (nms_boxes, nms_scores, nms_classes, valid_count).

    prefilter_topk: optional int K — keep only the K highest-objectness
    anchors before NMS (standard YOLO practice; exact unless more than K
    anchors pass the score threshold).  Default None = exact semantics.
    """
    boxes_l, obj_l, cls_l = [], [], []
    for raw in raw_yolo_output:
        b = raw[0].shape[0]
        c = raw[2].shape[-1]
        boxes_l.append(jnp.reshape(raw[0], (b, -1, 4)))
        obj_l.append(jnp.reshape(raw[1], (b, -1, 1)))
        cls_l.append(jnp.reshape(raw[2], (b, -1, c)))
    boxes = jnp.concatenate(boxes_l, axis=1).astype(jnp.float32)  # (B,N,4) xywh
    obj = jnp.concatenate(obj_l, axis=1).astype(jnp.float32)      # (B,N,1)
    cls = jnp.concatenate(cls_l, axis=1).astype(jnp.float32)      # (B,N,C)

    B, N, _ = boxes.shape
    C = cls.shape[-1]

    # Optional objectness top-K prefilter (shrinks the O(N) NMS loop work).
    if prefilter_topk is not None and prefilter_topk < N:
        _, top_idx = lax.top_k(obj[..., 0], int(prefilter_topk))  # (B, K)
        gather = lambda a: jnp.take_along_axis(a, top_idx[..., None], axis=1)
        boxes, obj, cls = gather(boxes), gather(obj), gather(cls)
        N = int(prefilter_topk)

    # Kernel input: only the 5 planes the NMS loop needs, as (B, 5, T, 128).
    five = jnp.concatenate([boxes, obj], axis=-1)                 # (B, N, 5)
    data = jnp.transpose(five, (0, 2, 1))                         # (B, 5, N)
    npad = _round_up(max(N, 1), 8 * 128)                          # dense tiles
    if npad != N:
        data = jnp.pad(data, ((0, 0), (0, 0), (0, npad - N)))
    data = data.reshape(B, 5, npad // 128, 128)   # anchor n -> (n//128, n%128)

    out = _run_nms(data, n_valid=N, iou_threshold=iou_threshold,
                   score_threshold=score_threshold,
                   max_detection=max_detection)                   # (B, 8, Mpad)

    det = out[:, :, :max_detection]                               # (B, 8, md)
    nms_boxes = jnp.transpose(det[:, 0:4, :], (0, 2, 1))          # (B, md, 4)
    nms_scores = jnp.transpose(det[:, 4:5, :], (0, 2, 1))         # (B, md, 1)

    count = out[:, 0, max_detection].astype(jnp.int32)            # (B,)
    valid = jnp.arange(max_detection)[None, :] < count[:, None]   # (B, md)

    # Tiny post-NMS class gather (<= max_detection rows) in plain JAX: keeps
    # the O(C * N) class planes out of the kernel and out of VMEM entirely.
    idx = jnp.clip(det[:, 5, :].astype(jnp.int32), 0, N - 1)      # (B, md)
    nms_classes = jnp.take_along_axis(cls, idx[..., None], axis=1)  # (B,md,C)
    nms_classes = jnp.where(valid[..., None], nms_classes, 0.0)

    valid_count = count[:, None]                                  # (B, 1) i32
    return nms_boxes, nms_scores, nms_classes, valid_count


if __name__ == "__main__":
    key = jax.random.PRNGKey(0)
    k = jax.random.split(key, 8)
    B, C = 2, 4

    def make_head(kc, ks, ko, kp, H, W, A):
        centers = jax.random.uniform(kc, (B, H, W, A, 2), minval=0.0, maxval=16.0)
        sizes = jax.random.uniform(ks, (B, H, W, A, 2), minval=1.0, maxval=6.0)
        boxes = jnp.concatenate([centers, sizes], axis=-1)   # xywh
        objectness = jax.random.uniform(ko, (B, H, W, A, 1))
        class_prob = jax.random.uniform(kp, (B, H, W, A, C))
        return (boxes, objectness, class_prob)

    head1 = make_head(k[0], k[1], k[2], k[3], 4, 4, 3)   # 48 anchors
    head2 = make_head(k[4], k[5], k[6], k[7], 2, 2, 3)   # 12 anchors

    nms_boxes, nms_scores, nms_classes, valid_count = postprocess(
        [head1, head2], iou_threshold=0.5, score_threshold=0.5,
        max_detection=100)
    jax.block_until_ready((nms_boxes, nms_scores, nms_classes, valid_count))

    assert nms_boxes.shape == (B, 100, 4)
    assert nms_scores.shape == (B, 100, 1)
    assert nms_classes.shape == (B, 100, C)
    assert valid_count.shape == (B, 1) and valid_count.dtype == jnp.int32

    # Sanity: kept detections are above threshold and sorted by score.
    for b in range(B):
        c = int(valid_count[b, 0])
        sb = nms_scores[b, :c, 0]
        assert bool(jnp.all(sb >= 0.5))
        assert bool(jnp.all(sb[1:] <= sb[:-1]))

    print("KERNEL_OK")
</pallas_src>

<mosaic_0001>
module attributes {stable_mosaic.version = 11 : i64} {
  func.func @_nms_kernel(%arg0: i32, %arg1: memref<1x5x8x128xf32, #tpu.memory_space<vmem>>, %arg2: memref<1x8x128xf32, #tpu.memory_space<vmem>>, %arg3: memref<8x128xf32, #tpu.memory_space<vmem>>) attributes {dimension_semantics = [#tpu.dimension_semantics<parallel>], iteration_bounds = array<i64: 2>, scalar_prefetch = 0 : i64, scratch_operands = 1 : i64, tpu.core_type = #tpu.core_type<tc>, window_params = [{transform_indices = @transform_0, window_bounds = array<i64: 1, 5, 8, 128>}, {transform_indices = @transform_1, window_bounds = array<i64: 1, 8, 128>}]} {
    %c0 = arith.constant 0 : index
    %c0_0 = arith.constant 0 : index
    %c0_1 = arith.constant 0 : index
    %c0_2 = arith.constant 0 : index
    %0 = vector.load %arg1[%c0, %c0_0, %c0_1, %c0_2] : memref<1x5x8x128xf32, #tpu.memory_space<vmem>>, vector<1x1x8x128xf32>
    %1 = vector.shape_cast %0 : vector<1x1x8x128xf32> to vector<8x128xf32>
    %c0_3 = arith.constant 0 : index
    %c1 = arith.constant 1 : index
    %c0_4 = arith.constant 0 : index
    %c0_5 = arith.constant 0 : index
    %2 = vector.load %arg1[%c0_3, %c1, %c0_4, %c0_5] : memref<1x5x8x128xf32, #tpu.memory_space<vmem>>, vector<1x1x8x128xf32>
    %3 = vector.shape_cast %2 : vector<1x1x8x128xf32> to vector<8x128xf32>
    %c0_6 = arith.constant 0 : index
    %c2 = arith.constant 2 : index
    %c0_7 = arith.constant 0 : index
    %c0_8 = arith.constant 0 : index
    %4 = vector.load %arg1[%c0_6, %c2, %c0_7, %c0_8] : memref<1x5x8x128xf32, #tpu.memory_space<vmem>>, vector<1x1x8x128xf32>
    %5 = vector.shape_cast %4 : vector<1x1x8x128xf32> to vector<8x128xf32>
    %c0_9 = arith.constant 0 : index
    %c3 = arith.constant 3 : index
    %c0_10 = arith.constant 0 : index
    %c0_11 = arith.constant 0 : index
    %6 = vector.load %arg1[%c0_9, %c3, %c0_10, %c0_11] : memref<1x5x8x128xf32, #tpu.memory_space<vmem>>, vector<1x1x8x128xf32>
    %7 = vector.shape_cast %6 : vector<1x1x8x128xf32> to vector<8x128xf32>
    %c0_12 = arith.constant 0 : index
    %c4 = arith.constant 4 : index
    %c0_13 = arith.constant 0 : index
    %c0_14 = arith.constant 0 : index
    %8 = vector.load %arg1[%c0_12, %c4, %c0_13, %c0_14] : memref<1x5x8x128xf32, #tpu.memory_space<vmem>>, vector<1x1x8x128xf32>
    %9 = vector.shape_cast %8 : vector<1x1x8x128xf32> to vector<8x128xf32>
    %cst = arith.constant 5.000000e-01 : f32
    %10 = vector.broadcast %cst : f32 to vector<8x128xf32>
    %11 = arith.mulf %10, %5 : vector<8x128xf32>
    %12 = arith.subf %1, %11 : vector<8x128xf32>
    %cst_15 = arith.constant 5.000000e-01 : f32
    %13 = vector.broadcast %cst_15 : f32 to vector<8x128xf32>
    %14 = arith.mulf %13, %7 : vector<8x128xf32>
    %15 = arith.subf %3, %14 : vector<8x128xf32>
    %cst_16 = arith.constant 5.000000e-01 : f32
    %16 = vector.broadcast %cst_16 : f32 to vector<8x128xf32>
    %17 = arith.mulf %16, %5 : vector<8x128xf32>
    %18 = arith.addf %1, %17 : vector<8x128xf32>
    %cst_17 = arith.constant 5.000000e-01 : f32
    %19 = vector.broadcast %cst_17 : f32 to vector<8x128xf32>
    %20 = arith.mulf %19, %7 : vector<8x128xf32>
    %21 = arith.addf %3, %20 : vector<8x128xf32>
    %22 = arith.subf %18, %12 : vector<8x128xf32>
    %23 = arith.subf %21, %15 : vector<8x128xf32>
    %24 = arith.mulf %22, %23 : vector<8x128xf32>
    %25 = vector.shape_cast %12 : vector<8x128xf32> to vector<1x8x128xf32>
    %26 = vector.shape_cast %15 : vector<8x128xf32> to vector<1x8x128xf32>
    %27 = vector.shape_cast %18 : vector<8x128xf32> to vector<1x8x128xf32>
    %28 = vector.shape_cast %21 : vector<8x128xf32> to vector<1x8x128xf32>
    %29 = tpu.concatenate %25, %26, %27, %28 in 0 : vector<1x8x128xf32>, vector<1x8x128xf32>, vector<1x8x128xf32>, vector<1x8x128xf32> -> vector<4x8x128xf32>
    %30 = tpu.iota {dimensions = array<i32: 0>} : vector<8x128xi32>
    %c128_i32 = arith.constant 128 : i32
    %31 = vector.broadcast %c128_i32 : i32 to vector<8x128xi32>
    %32 = arith.muli %30, %31 : vector<8x128xi32>
    %33 = tpu.iota {dimensions = array<i32: 1>} : vector<8x128xi32>
    %34 = arith.addi %32, %33 : vector<8x128xi32>
    %35 = arith.sitofp %34 : vector<8x128xi32> to vector<8x128xf32>
    %cst_18 = arith.constant 6.000000e+01 : f32
    %36 = vector.broadcast %cst_18 : f32 to vector<8x128xf32>
    %37 = arith.cmpf olt, %35, %36 : vector<8x128xf32>
    %cst_19 = arith.constant 5.000000e-01 : f32
    %38 = vector.broadcast %cst_19 : f32 to vector<8x128xf32>
    %39 = arith.cmpf oge, %9, %38 : vector<8x128xf32>
    %40 = arith.andi %37, %39 : vector<8x128xi1>
    %cst_20 = arith.constant -1.000000e+30 : f32
    %41 = vector.broadcast %cst_20 : f32 to vector<8x128xf32>
    %42 = arith.select %40, %9, %41 : vector<8x128xi1>, vector<8x128xf32>
    %c0_21 = arith.constant 0 : index
    %c0_22 = arith.constant 0 : index
    %43 = vector.load %arg3[%c0_21, %c0_22] : memref<8x128xf32, #tpu.memory_space<vmem>>, vector<8x128xf32>
    tpu.vector_store %arg3[%c0_21, %c0_22], %42 {strides = array<i32>} : memref<8x128xf32, #tpu.memory_space<vmem>>, vector<8x128xf32>,
    %cst_23 = arith.constant dense<0xFF800000> : vector<128xf32>
    %44 = vector.multi_reduction <maximumf>, %42, %cst_23 [0] : vector<8x128xf32> to vector<128xf32>
    %45 = vector.shape_cast %44 : vector<128xf32> to vector<1x128xf32>
    %46 = vector.shape_cast %45 : vector<1x128xf32> to vector<1x1x128xf32>
    %cst_24 = arith.constant dense<0xFF800000> : vector<1xf32>
    %47 = vector.multi_reduction <maximumf>, %46, %cst_24 [1, 2] : vector<1x1x128xf32> to vector<1xf32>
    %48 = vector.shape_cast %47 : vector<1xf32> to vector<1x1x1xf32>
    %49 = vector.extract %48[0, 0, 0] : f32 from vector<1x1x1xf32>
    %50 = tpu.iota {dimensions = array<i32: 1>} : vector<1x128xi32>
    %cst_25 = arith.constant 0.000000e+00 : f32
    %51 = vector.broadcast %cst_25 : f32 to vector<1x8x128xf32>
    %c0_26 = arith.constant 0 : index
    %c0_27 = arith.constant 0 : index
    %c0_28 = arith.constant 0 : index
    %52 = vector.load %arg2[%c0_26, %c0_27, %c0_28] : memref<1x8x128xf32, #tpu.memory_space<vmem>>, vector<1x8x128xf32>
    tpu.vector_store %arg2[%c0_26, %c0_27, %c0_28], %51 {strides = array<i32>} : memref<1x8x128xf32, #tpu.memory_space<vmem>>, vector<1x8x128xf32>,
    %cst_29 = arith.constant 1.000000e+00 : f32
    %53 = vector.broadcast %cst_29 : f32 to vector<1x1xf32>
    %cst_30 = arith.constant 0.000000e+00 : f32
    %54 = vector.broadcast %cst_30 : f32 to vector<2x1xf32>
    %cst_31 = arith.constant 1.024000e+03 : f32
    %c0_i32 = arith.constant 0 : i32
    %55:2 = scf.while (%arg4 = %c0_i32, %arg5 = %49) : (i32, f32) -> (i32, f32) {
      %c100_i32_38 = arith.constant 100 : i32
      %70 = arith.cmpi slt, %arg4, %c100_i32_38 : i32
      %cst_39 = arith.constant -5.000000e+29 : f32
      %71 = arith.cmpf ogt, %arg5, %cst_39 : f32
      %72 = arith.andi %70, %71 : i1
      scf.condition(%72) %arg4, %arg5 : i32, f32
    } do {
    ^bb0(%arg4: i32, %arg5: f32):
      %c0_38 = arith.constant 0 : index
      %c0_39 = arith.constant 0 : index
      %70 = vector.load %arg3[%c0_38, %c0_39] : memref<8x128xf32, #tpu.memory_space<vmem>>, vector<8x128xf32>
      %71 = vector.broadcast %arg5 : f32 to vector<8x128xf32>
      %72 = arith.cmpf oeq, %70, %71 : vector<8x128xf32>
      %73 = vector.broadcast %cst_31 : f32 to vector<8x128xf32>
      %74 = arith.select %72, %35, %73 : vector<8x128xi1>, vector<8x128xf32>
      %cst_40 = arith.constant dense<0x7F800000> : vector<128xf32>
      %75 = vector.multi_reduction <minimumf>, %74, %cst_40 [0] : vector<8x128xf32> to vector<128xf32>
      %76 = vector.shape_cast %75 : vector<128xf32> to vector<1x128xf32>
      %77 = vector.shape_cast %76 : vector<1x128xf32> to vector<1x1x128xf32>
      %cst_41 = arith.constant dense<0x7F800000> : vector<1xf32>
      %78 = vector.multi_reduction <minimumf>, %77, %cst_41 [1, 2] : vector<1x1x128xf32> to vector<1xf32>
      %79 = vector.shape_cast %78 : vector<1xf32> to vector<1x1x1xf32>
      %80 = vector.extract %79[0, 0, 0] : f32 from vector<1x1x1xf32>
      %81 = vector.broadcast %80 : f32 to vector<8x128xf32>
      %82 = arith.cmpf oeq, %35, %81 : vector<8x128xf32>
      %83 = vector.shape_cast %82 : vector<8x128xi1> to vector<1x8x128xi1>
      %cst_42 = arith.constant -1.000000e+30 : f32
      %84 = vector.shape_cast %83 : vector<1x8x128xi1> to vector<1x8x128xi1>
      %85 = vector.broadcast %84 : vector<1x8x128xi1> to vector<4x8x128xi1>
      %86 = vector.broadcast %cst_42 : f32 to vector<4x8x128xf32>
      %87 = arith.select %85, %29, %86 : vector<4x8x128xi1>, vector<4x8x128xf32>
      %cst_43 = arith.constant dense<0xFF800000> : vector<4x128xf32>
      %88 = vector.multi_reduction <maximumf>, %87, %cst_43 [1] : vector<4x8x128xf32> to vector<4x128xf32>
      %89 = vector.shape_cast %88 : vector<4x128xf32> to vector<4x1x128xf32>
      %cst_44 = arith.constant dense<0xFF800000> : vector<4x1xf32>
      %90 = vector.multi_reduction <maximumf>, %89, %cst_44 [2] : vector<4x1x128xf32> to vector<4x1xf32>
      %91 = vector.shape_cast %90 : vector<4x1xf32> to vector<4x1x1xf32>
      %92 = vector.extract_strided_slice %91 {offsets = [0, 0, 0], sizes = [1, 1, 1], strides = [1, 1, 1]} : vector<4x1x1xf32> to vector<1x1x1xf32>
      %93 = vector.shape_cast %92 : vector<1x1x1xf32> to vector<1x1xf32>
      %94 = vector.extract_strided_slice %91 {offsets = [1, 0, 0], sizes = [1, 1, 1], strides = [1, 1, 1]} : vector<4x1x1xf32> to vector<1x1x1xf32>
      %95 = vector.shape_cast %94 : vector<1x1x1xf32> to vector<1x1xf32>
      %96 = vector.extract_strided_slice %91 {offsets = [2, 0, 0], sizes = [1, 1, 1], strides = [1, 1, 1]} : vector<4x1x1xf32> to vector<1x1x1xf32>
      %97 = vector.shape_cast %96 : vector<1x1x1xf32> to vector<1x1xf32>
      %98 = vector.extract_strided_slice %91 {offsets = [3, 0, 0], sizes = [1, 1, 1], strides = [1, 1, 1]} : vector<4x1x1xf32> to vector<1x1x1xf32>
      %99 = vector.shape_cast %98 : vector<1x1x1xf32> to vector<1x1xf32>
      %100 = arith.subf %97, %93 : vector<1x1xf32>
      %101 = arith.subf %99, %95 : vector<1x1xf32>
      %102 = arith.mulf %100, %101 : vector<1x1xf32>
      %103 = vector.broadcast %97 : vector<1x1xf32> to vector<8x128xf32>
      %104 = arith.minimumf %103, %18 : vector<8x128xf32>
      %105 = vector.broadcast %93 : vector<1x1xf32> to vector<8x128xf32>
      %106 = arith.maximumf %105, %12 : vector<8x128xf32>
      %107 = arith.subf %104, %106 : vector<8x128xf32>
      %cst_45 = arith.constant 0.000000e+00 : f32
      %108 = vector.broadcast %cst_45 : f32 to vector<8x128xf32>
      %109 = arith.maximumf %107, %108 : vector<8x128xf32>
      %110 = vector.broadcast %99 : vector<1x1xf32> to vector<8x128xf32>
      %111 = arith.minimumf %110, %21 : vector<8x128xf32>
      %112 = vector.broadcast %95 : vector<1x1xf32> to vector<8x128xf32>
      %113 = arith.maximumf %112, %15 : vector<8x128xf32>
      %114 = arith.subf %111, %113 : vector<8x128xf32>
      %cst_46 = arith.constant 0.000000e+00 : f32
      %115 = vector.broadcast %cst_46 : f32 to vector<8x128xf32>
      %116 = arith.maximumf %114, %115 : vector<8x128xf32>
      %117 = arith.mulf %109, %116 : vector<8x128xf32>
      %118 = vector.broadcast %102 : vector<1x1xf32> to vector<8x128xf32>
      %119 = arith.addf %118, %24 : vector<8x128xf32>
      %120 = arith.subf %119, %117 : vector<8x128xf32>
      %cst_47 = arith.constant 5.000000e-01 : f32
      %121 = vector.broadcast %cst_47 : f32 to vector<8x128xf32>
      %122 = arith.mulf %121, %120 : vector<8x128xf32>
      %123 = arith.cmpf ogt, %117, %122 : vector<8x128xf32>
      %124 = arith.ori %82, %123 : vector<8x128xi1>
      %cst_48 = arith.constant -1.000000e+30 : f32
      %125 = vector.broadcast %cst_48 : f32 to vector<8x128xf32>
      %126 = arith.select %124, %125, %70 : vector<8x128xi1>, vector<8x128xf32>
      %c0_49 = arith.constant 0 : index
      %c0_50 = arith.constant 0 : index
      %127 = vector.load %arg3[%c0_49, %c0_50] : memref<8x128xf32, #tpu.memory_space<vmem>>, vector<8x128xf32>
      tpu.vector_store %arg3[%c0_49, %c0_50], %126 {strides = array<i32>} : memref<8x128xf32, #tpu.memory_space<vmem>>, vector<8x128xf32>,
      %128 = vector.shape_cast %91 : vector<4x1x1xf32> to vector<4x1xf32>
      %129 = vector.broadcast %arg5 : f32 to vector<1x1xf32>
      %130 = arith.mulf %129, %53 : vector<1x1xf32>
      %131 = vector.broadcast %80 : f32 to vector<1x1xf32>
      %132 = arith.mulf %131, %53 : vector<1x1xf32>
      %133 = tpu.concatenate %128, %130, %132, %54 in 0 : vector<4x1xf32>, vector<1x1xf32>, vector<1x1xf32>, vector<2x1xf32> -> vector<8x1xf32>
      %134 = vector.broadcast %arg4 : i32 to vector<1x128xi32>
      %135 = arith.cmpi eq, %50, %134 : vector<1x128xi32>
      %136 = arith.extui %135 : vector<1x128xi1> to vector<1x128xi32>
      %137 = arith.sitofp %136 : vector<1x128xi32> to vector<1x128xf32>
      %c0_51 = arith.constant 0 : index
      %c0_52 = arith.constant 0 : index
      %c0_53 = arith.constant 0 : index
      %138 = vector.load %arg2[%c0_51, %c0_52, %c0_53] : memref<1x8x128xf32, #tpu.memory_space<vmem>>, vector<1x8x128xf32>
      %139 = vector.shape_cast %138 : vector<1x8x128xf32> to vector<8x128xf32>
      %140 = vector.broadcast %133 : vector<8x1xf32> to vector<8x128xf32>
      %141 = vector.broadcast %137 : vector<1x128xf32> to vector<8x128xf32>
      %142 = arith.mulf %140, %141 : vector<8x128xf32>
      %143 = arith.addf %139, %142 : vector<8x128xf32>
      %c0_54 = arith.constant 0 : index
      %c0_55 = arith.constant 0 : index
      %c0_56 = arith.constant 0 : index
      %144 = vector.load %arg2[%c0_54, %c0_55, %c0_56] : memref<1x8x128xf32, #tpu.memory_space<vmem>>, vector<1x8x128xf32>
      %145 = vector.shape_cast %144 : vector<1x8x128xf32> to vector<8x128xf32>
      %146 = vector.shape_cast %143 : vector<8x128xf32> to vector<1x8x128xf32>
      tpu.vector_store %arg2[%c0_54, %c0_55, %c0_56], %146 {strides = array<i32>} : memref<1x8x128xf32, #tpu.memory_space<vmem>>, vector<1x8x128xf32>,
      %c1_i32 = arith.constant 1 : i32
      %147 = arith.addi %arg4, %c1_i32 : i32
      %cst_57 = arith.constant dense<0xFF800000> : vector<128xf32>
      %148 = vector.multi_reduction <maximumf>, %126, %cst_57 [0] : vector<8x128xf32> to vector<128xf32>
      %149 = vector.shape_cast %148 : vector<128xf32> to vector<1x128xf32>
      %150 = vector.shape_cast %149 : vector<1x128xf32> to vector<1x1x128xf32>
      %cst_58 = arith.constant dense<0xFF800000> : vector<1xf32>
      %151 = vector.multi_reduction <maximumf>, %150, %cst_58 [1, 2] : vector<1x1x128xf32> to vector<1xf32>
      %152 = vector.shape_cast %151 : vector<1xf32> to vector<1x1x1xf32>
      %153 = vector.extract %152[0, 0, 0] : f32 from vector<1x1x1xf32>
      scf.yield %147, %153 : i32, f32
    }
    %c100_i32 = arith.constant 100 : i32
    %56 = vector.broadcast %c100_i32 : i32 to vector<1x128xi32>
    %57 = arith.cmpi eq, %50, %56 : vector<1x128xi32>
    %58 = arith.extui %57 : vector<1x128xi1> to vector<1x128xi32>
    %59 = arith.sitofp %58 : vector<1x128xi32> to vector<1x128xf32>
    %c0_32 = arith.constant 0 : index
    %c0_33 = arith.constant 0 : index
    %c0_34 = arith.constant 0 : index
    %60 = vector.load %arg2[%c0_32, %c0_33, %c0_34] : memref<1x8x128xf32, #tpu.memory_space<vmem>>, vector<1x8x128xf32>
    %61 = vector.shape_cast %60 : vector<1x8x128xf32> to vector<8x128xf32>
    %62 = arith.sitofp %55#0 : i32 to f32
    %63 = vector.broadcast %62 : f32 to vector<1x128xf32>
    %64 = arith.mulf %63, %59 : vector<1x128xf32>
    %65 = vector.broadcast %64 : vector<1x128xf32> to vector<8x128xf32>
    %66 = arith.addf %61, %65 : vector<8x128xf32>
    %c0_35 = arith.constant 0 : index
    %c0_36 = arith.constant 0 : index
    %c0_37 = arith.constant 0 : index
    %67 = vector.load %arg2[%c0_35, %c0_36, %c0_37] : memref<1x8x128xf32, #tpu.memory_space<vmem>>, vector<1x8x128xf32>
    %68 = vector.shape_cast %67 : vector<1x8x128xf32> to vector<8x128xf32>
    %69 = vector.shape_cast %66 : vector<8x128xf32> to vector<1x8x128xf32>
    tpu.vector_store %arg2[%c0_35, %c0_36, %c0_37], %69 {strides = array<i32>} : memref<1x8x128xf32, #tpu.memory_space<vmem>>, vector<1x8x128xf32>,
    return
  }
  func.func @transform_0(%arg0: i32) -> (i32, i32, i32, i32) {
    %c0_i32 = arith.constant 0 : i32
    %c0_i32_0 = arith.constant 0 : i32
    %c0_i32_1 = arith.constant 0 : i32
    %c0_i32_2 = arith.constant 0 : i32
    return %arg0, %c0_i32, %c0_i32_0, %c0_i32_1 : i32, i32, i32, i32
  }
  func.func @transform_1(%arg0: i32) -> (i32, i32, i32) {
    %c0_i32 = arith.constant 0 : i32
    %c0_i32_0 = arith.constant 0 : i32
    %c0_i32_1 = arith.constant 0 : i32
    return %arg0, %c0_i32, %c0_i32_0 : i32, i32, i32
  }
}

</mosaic_0001>

<bundles_post_ra>
// kernel: tpu_custom_call.1
= control target key start
LH: loop header
LB: loop body
LE: loop exit
PB: predicated region body
PF: predicated region fallthrough
CT: control target
= control target key end

     0   :  { %6 = vsyncpa [#allocation4], 0  ;;  %s890_s0 = inlined_call_operand.hbm [shape: f32[2,5,8,128], index: 0, kind: input, shape index: {}]   ;;  %s891_s1 = inlined_call_operand.hbm [shape: f32[2,8,128], index: 1, kind: output, shape index: {}]  }
   0x1   :  { %8 = vsyncpa [#allocation4 + $0x1], 0 }
   0x2   :  { %9 = vsyncpa [#allocation5], 0 }
   0x3   :  { %11 = vsyncpa [#allocation5 + $0x1], 0  ;;  %s640_s6 = smov 0   ;;  %s642_s7 = smov 0  }
   0x4   :  { %s644_s8 = smov 0   ;;  %s646_s9 = smov 0  }
   0x5 LB: > { %s661_s10 = sadd.s32 4294967295, %s609_s9   ;;  %s399_s11 = sadd.s32 4294967294, %s609_s9   ;;  %s609_s9 = sphi %s646_s9, %s907_s9   ;;  %s605_s8 = sphi %s644_s8, %s906_s8   ;;  %s601_s7 = sphi %s642_s7, %s905_s7   ;;  %s597_s6 = sphi %s640_s6, %s904_s6  }
   0x6   : > { %s665_s12 = sadd.s32 1, %s609_s9   ;;  %s24_s13 = sadd.s32 1, %s605_s8 }
   0x7   : > { %s21_s14 = ssub.s32 %s609_s9, %s665_s12  ;;  %p31_p0 = scmp.ne.s32.totalorder %s605_s8, %s601_s7 }
   0x8   : > { %p22_p1 = scmp.eq.s32.totalorder %s21_s14, 0  ;;  %p32_p2 = scmp.eq.s32.totalorder %s609_s9, 0 }
   0x9   : > { %p37_p3 = scmp.ne.s32.totalorder %s601_s7, %s597_s6  ;;  %p38_p4 = scmp.eq.s32.totalorder %s661_s10, 0 }
   0xa   : > { %s677_s15 = scalar_select %p22_p1, %s605_s8, %s24_s13  }
   0xb   : > { %p33_p5 = por %p32_p2, %p31_p0  ;;  %p679_p6 = por %p38_p4, %p37_p3 }
   0xc   : > { %p61_p7 = scmp.eq.s32.totalorder %s661_s10, 1  ;;  %p67_p8 = scmp.eq.s32.totalorder %s399_s11, 1 }
   0xd   : > { %p437_p10 = scmp.lt.s32.totalorder %s609_s9, 2  ;;  %s87_s19 = sand.u32 1, %s605_s8  }
   0xe   : > { %p686_p11 = por %p61_p7, %p31_p0  ;;  %p690_p12 = por %p67_p8, %p37_p3 }
   0xf   : > { %s417_s20 = smul.u32 640, %s609_s9  ;;  %p701_p13 = pnand %p437_p10, %p33_p5 }
  0x10   : > { %s894_s17 = scalar_select %p686_p11, 1, 0 }
  0x11   : > { %s895_s18 = scalar_select %p690_p12, 1, 0 }
  0x12   : > { %s416_s21 = smul.u32 40, %s87_s19  ;;  %s699_s24 = scalar_lea.hbm %s890_s0, %s417_s20 }
  0x13   : > { %s707_s28 = scalar_lea.sflag [#allocation4], %s87_s19  ;;  %s501_s29 = scalar_lea.hbm %s699_s24, 640 }
  0x14   : > { %s91_s26 = scalar_lea.vmem [#allocation3], %s416_s21  ;;  %p502_p0 = scmp.ne.s32.totalorder %s699_s24, %s501_s29 }
  0x15   : > { %s98_s27 = sshll.u32 %s91_s26, 4  ;;  %p503_p1 = pneg %p701_p13  ;;  %s705_s27 = int_to_ptr.vmem [resolvable:$true] %s98_s27 }
  0x16   : > { %s506_s3 = scalar_lea.hbm %s890_s0, 1280  ;;  %p507_p4 = scmp.lt.u32.totalorder %s699_s24, %s890_s0 }
  0x17   : > { %p504_p2 = pnand %p503_p1, %p502_p0  ;;  %p508_p5 = scmp.lt.u32.totalorder %s506_s3, %s501_s29 }
  0x18   : > { %p510_p8 = scmp.lt.u32.totalorder %s501_s29, %s699_s24 }
  0x19   : > { %p505_p3 = pneg %p504_p2  ;;  %p509_p7 = por %p508_p5, %p507_p4 }
  0x1b   : > { %p511_p10 = por %p510_p8, %p509_p7 }
  0x1d   : > { %p512_p9 = pnand %p511_p10, %p505_p3 }
  0x1f   : > { %515 = shalt.err (!%p512_p9)
}
  0x20   : > { %s516_s11 = scalar_lea.vmem %s705_s27, 640  ;;  %s623_s13 = smov [#allocation3]  }
  0x21   : > { %p517_p0 = scmp.ne.s32.totalorder %s705_s27, %s516_s11  ;;  %s521_s14 = sshll.u32 %s623_s13, 4  ;;  %s522_s14 = int_to_ptr.vmem [resolvable:$false] %s521_s14 }
  0x22   : > { %s523_s19 = scalar_lea.vmem %s522_s14, 1280  ;;  %p524_p11 = scmp.lt.s32.totalorder %s705_s27, %s522_s14 }
  0x23   : > { %p519_p2 = pnand %p517_p0, %p503_p1  ;;  %p525_p4 = scmp.lt.s32.totalorder %s523_s19, %s516_s11 }
  0x25   : > { %p520_p12 = pneg %p519_p2  ;;  %p526_p5 = por %p525_p4, %p524_p11 }
  0x27   : > { %p527_p7 = pnand %p526_p5, %p520_p12 }
  0x29   : > { %530 = shalt.err (!%p527_p7)
}
  0x2a   : > { %s624_s20 = smov 128   ;;  %s625_s21 = smov 8  }
  0x2b   : > { %432 = dma.hbm_to_vmem [thread:$0]  (!%p701_p13), %s699_s24, 640, %s705_s27, %s707_s28, %s624_s20, %s624_s20, %s625_s21  }
  0x2c   : > { %p403_p9 = scmp.ge.s32.totalorder %s609_s9, 1  ;;  %p106_p1 = scmp.lt.s32.totalorder %s609_s9, 3 }
  0x2e   : > { %p107_p3 = pnand %p403_p9, %p106_p1 }
  0x2f   : > { %s738_s22 = sand.u32 (!%p107_p3), 1, %s601_s7  }
  0x30   : > { %110 = sbr.rel (%p107_p3) target bundleno = 907 (0x38b), region = 24  ;;  %s113_s26 = scalar_lea.sflag (!%p107_p3), [#allocation4], %s738_s22 }
  0x31   : > { %s418_s23 = smul.u32 (!%p107_p3), 40, %s738_s22 }
  0x33   : > { %s116_s29 = scalar_lea.vmem (!%p107_p3), [#allocation3], %s418_s23 }
  0x37   : > { %588 = dma.done.wait (%p679_p6), %s113_s26, 640  }
  0x38   : > { %590 = vsyncadd (%p679_p6), %s113_s26, 4294966656  ;;  %s404_s24 = sshll.u32 %s738_s22, 3  ;;  %v153_v0 = vlaneseq  ;;  %v626_v1 = vmov 0.0   ;;  %v135_v6 = vld [vmem:[%s116_s29] sm:$0xff]  ;;  %v406_v7 = vld [vmem:[%s116_s29 + $0x10] sm:$0xff]  ;;  %s771_s27 = smov 0  }
  0x39   : > { %s747_s25 = scalar_lea.vmem [#allocation6], %s404_s24  ;;  %v405_v8 = vld [vmem:[%s116_s29 + $0x8] sm:$0xff]  ;;  %v407_v9 = vld [vmem:[%s116_s29 + $0x18] sm:$0xff]  ;;  %v144_v10 = vmul.f32 0.5, %v406_v7  ;;  %v408_v11 = vld [vmem:[%s116_s29 + $0x20] sm:$0xff] }
  0x3a   : > { %174 = vst [vmem:[%s747_s25] sm:$0xff] %v626_v1  ;;  %v154_v2 = vshrl.u32 %v153_v0, 7  ;;  %v751_v3 = vand.u32 127, %v153_v0  ;;  %v146_v13 = vmul.f32 0.5, %v407_v9  ;;  %vm161_vm0 = vcmp.ge.f32.partialorder %v408_v11, 0.5 }
  0x3b   : > { %v756_v14 = vsub.f32 %v135_v6, %v144_v10  ;;  %v758_v15 = vadd.f32 %v144_v10, %v135_v6 }
  0x3c   : > { %v155_v4 = vmul.u32 128, %v154_v2  ;;  %v761_v16 = vsub.f32 %v405_v8, %v146_v13  ;;  %v763_v17 = vadd.f32 %v405_v8, %v146_v13 }
  0x3d   : > { %v150_v18 = vsub.f32 %v758_v15, %v756_v14 }
  0x3e   : > { %v158_v5 = vadd.s32 %v751_v3, %v155_v4  ;;  %v151_v20 = vsub.f32 %v763_v17, %v761_v16 }
  0x40   : > { %v754_v12 = vcvt.s32.f32 %v158_v5  ;;  %v769_v22 = vmul.f32 %v151_v20, %v150_v18 }
  0x42   : > { %vm160_vm1 = vcmp.lt.f32.partialorder %v754_v12, 60.0 }
  0x43   : > { %vm162_vm2 = vmand %vm160_vm1, %vm161_vm0 }
  0x44   : > { %v163_v19 = vsel %vm162_vm2, %v408_v11, -1e+30 }
  0x45   : > { %164 = vst [vmem:[#allocation2] sm:$0xff] %v163_v19  ;;  %v165_v21 = vrot.slane %v163_v19, 4 }
  0x47   : > { %v166_v23 = vmax.f32 %v163_v19, %v165_v21 }
  0x49   : > { %v167_v24 = vrot.slane %v166_v23, 2 }
  0x4b   : > { %v168_v25 = vmax.f32 %v166_v23, %v167_v24 }
  0x4d   : > { %v169_v26 = vrot.slane %v168_v25, 1 }
  0x4f   : > { %v170_v27 = vmax.f32 %v168_v25, %v169_v26 }
  0x51   : > { %171 = vmax.xlane.f32.xlu0 %v170_v27 }
  0xde   : > { %v172_v28 = vpop.xlane.xlu0 %171 }
  0xdf   : > { %419 = vpush %v172_v28 }
 0x110   : > { %s420_s16 = spop %419  }
 0x111   : > { %p368_p6 = scmp.gt.f32.partialorder %s420_s16, -5e+29 }
 0x112   : > { %s775_s28 = smov (%p368_p6), 0  }
 0x113   : > { %370 = sbr.rel (!%p368_p6) target bundleno = 881 (0x371), region = 74 }
 0x11a LB: >> { %v783_v29 = vld [vmem:[#allocation2] sm:$0xff]  ;;  %v185_v30 = vstv %s613_s16  ;;  %v627_v7 = vmov 0   ;;  %s811_s2 = sadd.s32 1, %s617_s28   ;;  %vm260_vm5 = vcmask 1041409   ;;  %vm262_vm6 = vcmask 1042434   ;;  %s617_s28 = sphi %s775_s28, %s899_s28   ;;  %s613_s16 = sphi %s420_s16, %s424_s16  }
 0x11b   : >> { %vm186_vm3 = vcmp.eq.f32.partialorder %v783_v29, %v185_v30  ;;  %500 = vset.pattern.permute.xlu0 %v627_v7  ;;  %vm264_vm7 = vcmask 1043459   ;;  %vm267_vm8 = vcmask 1043456   ;;  %vm269_vm9 = vcmask 1044480   ;;  %p178_p11 = scmp.lt.s32.totalorder %s811_s2, 100 }
 0x11c   : >> { %v187_v31 = vsel %vm186_vm3, %v754_v12, 1024.0  ;;  %vm271_vm10 = vcmask 1045504  }
 0x11d   : >> { %v188_v32 = vrot.slane %v187_v31, 4 }
 0x11f   : >> { %v189_v33 = vmin.f32 %v187_v31, %v188_v32 }
 0x121   : >> { %v190_v34 = vrot.slane %v189_v33, 2 }
 0x123   : >> { %v191_v35 = vmin.f32 %v189_v33, %v190_v34 }
 0x125   : >> { %v192_v36 = vrot.slane %v191_v35, 1 }
 0x127   : >> { %v193_v37 = vmin.f32 %v191_v35, %v192_v36 }
 0x129   : >> { %194 = vmin.xlane.f32.xlu0 %v193_v37 }
 0x1b6   : >> { %v195_v38 = vpop.xlane.xlu0 %194 }
 0x1b7   : >> { %421 = vpush %v195_v38 }
 0x1e8   : >> { %s790_s30 = spop %421 }
 0x1e9   : >> { %v197_v39 = vstv %s790_s30 }
 0x1ea   : >> { %vm794_vm4 = vcmp.eq.f32.partialorder %v754_v12, %v197_v39 }
 0x1eb   : >> { %v202_v41 = vsel %vm794_vm4, %v761_v16, -1e+30  ;;  %v201_v42 = vsel %vm794_vm4, %v756_v14, -1e+30  ;;  %v203_v43 = vsel %vm794_vm4, %v758_v15, -1e+30 }
 0x1ec   : >> { %v211_v44 = vrot.slane %v202_v41, 4  ;;  %v205_v45 = vrot.slane %v201_v42, 4  ;;  %v217_v46 = vrot.slane %v203_v43, 4  ;;  %v204_v47 = vsel %vm794_vm4, %v763_v17, -1e+30 }
 0x1ed   : >> { %v223_v48 = vrot.slane %v204_v47, 4 }
 0x1ee   : >> { %v212_v49 = vmax.f32 %v202_v41, %v211_v44  ;;  %v206_v50 = vmax.f32 %v201_v42, %v205_v45  ;;  %v218_v51 = vmax.f32 %v203_v43, %v217_v46 }
 0x1ef   : >> { %v224_v52 = vmax.f32 %v204_v47, %v223_v48  ;;  %v273_v48 = vstv %s617_s28  ;;  %s899_s28 = smov %s811_s2 }
 0x1f0   : >> { %v213_v53 = vrot.slane %v212_v49, 2  ;;  %v207_v54 = vrot.slane %v206_v50, 2  ;;  %v219_v55 = vrot.slane %v218_v51, 2  ;;  %vm274_vm13 = vcmp.eq.s32.totalorder %v751_v3, %v273_v48 }
 0x1f1   : >> { %v225_v56 = vrot.slane %v224_v52, 2 }
 0x1f2   : >> { %v214_v57 = vmax.f32 %v212_v49, %v213_v53  ;;  %v208_v58 = vmax.f32 %v206_v50, %v207_v54  ;;  %v220_v59 = vmax.f32 %v218_v51, %v219_v55  ;;  %v628_v49 = vmov 0.0   ;;  %v277_v51 = vld [vmem:[%s747_s25] sm:$0xff] }
 0x1f3   : >> { %v226_v60 = vmax.f32 %v224_v52, %v225_v56  ;;  %v410_v50 = vsel %vm274_vm13, 1.0, %v628_v49 }
 0x1f4   : >> { %v215_v61 = vrot.slane %v214_v57, 1  ;;  %v209_v62 = vrot.slane %v208_v58, 1  ;;  %v221_v2 = vrot.slane %v220_v59, 1 }
 0x1f5   : >> { %v227_v4 = vrot.slane %v226_v60, 1 }
 0x1f6   : >> { %v216_v63 = vmax.f32 %v214_v57, %v215_v61  ;;  %v210_v0 = vmax.f32 %v208_v58, %v209_v62  ;;  %v222_v5 = vmax.f32 %v220_v59, %v221_v2 }
 0x1f7   : >> { %v228_v6 = vmax.f32 %v226_v60, %v227_v4 }
 0x1f8   : >> { %231 = vmax.xlane.f32.xlu1 %v216_v63  ;;  %229 = vmax.xlane.f32.xlu0 %v210_v0 }
 0x1fc   : >> { %233 = vmax.xlane.f32.xlu1 %v222_v5  ;;  %235 = vmax.xlane.f32.xlu0 %v228_v6 }
 0x285   : >> { %v232_v8 = vpop.xlane.xlu1 %231  ;;  %v230_v9 = vpop.xlane.xlu0 %229 }
 0x286   : >> { %v241_v10 = vmax.f32 %v230_v9, %v756_v14  ;;  %v261_v11 = vsel %vm260_vm5, %v232_v8, %v230_v9  ;;  %v245_v24 = vmax.f32 %v232_v8, %v761_v16 }
 0x289   : >> { %v234_v13 = vpop.xlane.xlu1 %233  ;;  %v236_v18 = vpop.xlane.xlu0 %235 }
 0x28a   : >> { %v237_v19 = vsub.f32 %v234_v13, %v230_v9  ;;  %v240_v20 = vmin.f32 %v234_v13, %v758_v15  ;;  %v263_v21 = vsel %vm262_vm6, %v234_v13, %v261_v11  ;;  %v238_v23 = vsub.f32 %v236_v18, %v232_v8 }
 0x28b   : >> { %v244_v25 = vmin.f32 %v236_v18, %v763_v17  ;;  %v265_v26 = vsel %vm264_vm7, %v236_v18, %v263_v21 }
 0x28c   : >> { %v242_v27 = vsub.f32 %v240_v20, %v241_v10  ;;  %v268_v28 = vsel %vm267_vm8, %v265_v26, %v185_v30  ;;  %v239_v31 = vmul.f32 %v238_v23, %v237_v19 }
 0x28d   : >> { %v246_v32 = vsub.f32 %v244_v25, %v245_v24  ;;  %v270_v33 = vsel %vm269_vm9, %v268_v28, %v197_v39 }
 0x28e   : >> { %v243_v34 = vmax.f32 %v242_v27, 0.0  ;;  %v272_v35 = vsel %vm271_vm10, %v270_v33, 0.0  ;;  %v249_v38 = vadd.f32 %v239_v31, %v769_v22 }
 0x28f   : >> { %v247_v36 = vmax.f32 %v246_v32, 0.0  ;;  %280 = vperm.xlu0 %500, %v272_v35  }
 0x291   : >> { %v248_v37 = vmul.f32 %v247_v36, %v243_v34 }
 0x293   : >> { %v250_v41 = vsub.f32 %v249_v38, %v248_v37 }
 0x295   : >> { %v251_v42 = vmul.f32 0.5, %v250_v41 }
 0x297   : >> { %vm252_vm11 = vcmp.gt.f32.partialorder %v248_v37, %v251_v42 }
 0x298   : >> { %vm253_vm12 = vmor %vm794_vm4, %vm252_vm11 }
 0x299   : >> { %v254_v30 = vsel %vm253_vm12, -1e+30, %v783_v29 }
 0x29a   : >> { %v287_v43 = vrot.slane %v254_v30, 4  ;;  %255 = vst [vmem:[#allocation2] sm:$0xff] %v254_v30 }
 0x29c   : >> { %v288_v39 = vmax.f32 %v254_v30, %v287_v43 }
 0x29e   : >> { %v289_v44 = vrot.slane %v288_v39, 2 }
 0x2a0   : >> { %v290_v45 = vmax.f32 %v288_v39, %v289_v44 }
 0x2a2   : >> { %v291_v46 = vrot.slane %v290_v45, 1 }
 0x2a4   : >> { %v292_v47 = vmax.f32 %v290_v45, %v291_v46 }
 0x2a6   : >> { %293 = vmax.xlane.f32.xlu1 %v292_v47 }
 0x30e   : >> { %v281_v52 = vpop.permute.xlu0 %280 }
 0x30f   : >> { %v283_v40 = vmul.f32 %v410_v50, %v281_v52 }
 0x311   : >> { %v284_v53 = vadd.f32 %v283_v40, %v277_v51 }
 0x313   : >> { %285 = vst [vmem:[%s747_s25] sm:$0xff] %v284_v53 }
 0x333   : >> { %v294_v29 = vpop.xlane.xlu1 %293 }
 0x334   : >> { %423 = vpush %v294_v29 }
 0x365   : >> { %s424_s16 = spop %423  }
 0x366   : >> { %p179_p12 = scmp.gt.f32.partialorder %s424_s16, -5e+29 }
 0x368   : >> { %p180_p13 = pnand %p179_p12, %p178_p11 }
 0x369   : > { %s900_s27 = smov (%p180_p13), %s811_s2 }
 0x36a   : > { %183 = sbr.rel (!%p180_p13) target bundleno = 282 (0x11a), region = 80 }
 0x371 PF: > { %vm296_vm14 = vcmp.eq.s32.totalorder %v751_v3, 100  ;;  %s300_s3 = scvt.s32.f32 %s621_s27  ;;  %v299_v55 = vld [vmem:[%s747_s25] sm:$0xff]  ;;  %s413_s4 = sshll.u32 %s661_s10, 7  ;;  %s621_s27 = sphi %s771_s27, %s900_s27  }
 0x372   : > { %v411_v54 = vsel %vm296_vm14, 1.0, %v626_v1  ;;  %s319_s5 = sshll.u32 %s747_s25, 4  ;;  %s845_s14 = scalar_lea.hbm %s891_s1, %s413_s4  ;;  %s847_s5 = int_to_ptr.vmem [resolvable:$true] %s319_s5 }
 0x373   : > { %v301_v56 = vstv %s300_s3  ;;  %s306_s19 = scalar_lea.sflag [#allocation5], %s738_s22  ;;  %s531_s20 = scalar_lea.vmem %s847_s5, 128 }
 0x374   : > { %v302_v12 = vmul.f32 %v411_v54, %v301_v56  ;;  %p532_p8 = scmp.ne.s32.totalorder %s847_s5, %s531_s20  ;;  %p901_p10 = scmp.ne.s32.totalorder %s894_s17, 0 }
 0x375   : > { %s629_s10 = smov [#allocation6]  }
 0x376   : > { %v303_v14 = vadd.f32 %v302_v12, %v299_v55  ;;  %p533_p0 = pnand %p532_p8, %p901_p10  ;;  %s535_s21 = sshll.u32 %s629_s10, 4  ;;  %s536_s21 = int_to_ptr.vmem [resolvable:$false] %s535_s21 }
 0x377   : > { %s537_s23 = scalar_lea.vmem %s536_s21, 256  ;;  %p538_p4 = scmp.lt.s32.totalorder %s847_s5, %s536_s21 }
 0x378   : > { %304 = vst [vmem:[%s747_s25] sm:$0xff] %v303_v14  ;;  %p534_p2 = pneg %p533_p0  ;;  %p539_p5 = scmp.lt.s32.totalorder %s537_s23, %s531_s20 }
 0x37a   : > { %p540_p7 = por %p539_p5, %p538_p4 }
 0x37c   : > { %p541_p9 = pnand %p540_p7, %p534_p2 }
 0x37e   : > { %544 = shalt.err (!%p541_p9)
}
 0x37f   : > { %s545_s22 = scalar_lea.hbm %s845_s14, 128  ;;  %s549_s24 = scalar_lea.hbm %s891_s1, 256 }
 0x380   : > { %p546_p1 = scmp.ne.s32.totalorder %s845_s14, %s545_s22  ;;  %p550_p11 = scmp.lt.u32.totalorder %s845_s14, %s891_s1 }
 0x381   : > { %p551_p12 = scmp.lt.u32.totalorder %s549_s24, %s545_s22  ;;  %p553_p8 = scmp.lt.u32.totalorder %s545_s22, %s845_s14 }
 0x382   : > { %p547_p3 = pnand %p546_p1, %p901_p10 }
 0x383   : > { %p552_p13 = por %p551_p12, %p550_p11 }
 0x384   : > { %p548_p6 = pneg %p547_p3 }
 0x385   : > { %p554_p0 = por %p553_p8, %p552_p13 }
 0x387   : > { %p555_p2 = pnand %p554_p0, %p548_p6 }
 0x389   : > { %558 = shalt.err (!%p555_p2)
}
 0x38a   : > { %427 = dma.vmem_to_hbm [thread:$0]  (%p901_p10), %s847_s5, 128, %s845_s14, %s306_s19  }
 0x38b PF: > { %s331_s27 = sand.u32 1, %s597_s6   ;;  %p902_p4 = scmp.ne.s32.totalorder %s895_s18, 0 }
 0x38c   : > { %p903_p5 = scmp.ge.s32.totalorder %s609_s9, 2  ;;  %s332_s28 = scalar_lea.sflag [#allocation5], %s331_s27 }
 0x38e   : > { %p434_p7 = pnand %p903_p5, %p902_p4 }
 0x390   : > { %592 = dma.done.wait (!%p434_p7), %s332_s28, 128  }
 0x391   : > { %594 = vsyncadd (!%p434_p7), %s332_s28, 4294967168  ;;  %p14_p9 = scmp.ge.s32.totalorder %s665_s12, 4   ;;  %s904_s6 = smov %s601_s7 }
 0x392   : > { %s905_s7 = smov %s605_s8  ;;  %s906_s8 = smov %s677_s15 }
 0x393   : > { %s907_s9 = smov %s665_s12  ;;  %16 = sbr.rel (!%p14_p9) target bundleno = 5 (0x5), region = 91 }
 0x39a   :  { %337 = vsyncpa [#allocation4], 1 }
 0x39b   :  { %339 = vsyncpa [#allocation4 + $0x1], 1 }
 0x39c   :  { %340 = vsyncpa [#allocation5], 1 }
 0x39d   :  { %342 = vsyncpa [#allocation5 + $0x1], 1 }

</bundles_post_ra>
